<compile_context>
chip_gen: v7x
topology: tpu7x:2x2x1
jax: 0.10.0
libtpu: 0.0.40
codegen_flags: <defaults>
</compile_context>

<pallas_src>
import math
import functools

import jax
import jax.numpy as jnp
from jax.experimental import pallas as pl
from jax.experimental.pallas import tpu as pltpu


# ----------------------------- Pallas kernels ------------------------------

def _linear_tiled_kernel(x_ref, w_ref, b_ref, o_ref, acc_ref):
    """Tiled y = x @ w + b with f32 accumulator over the k grid axis."""
    @pl.when(pl.program_id(2) == 0)
    def _():
        acc_ref[...] = jnp.zeros_like(acc_ref)

    w = w_ref[...]
    acc_ref[...] += jnp.dot(x_ref[...].astype(w.dtype), w,
                            preferred_element_type=jnp.float32)

    @pl.when(pl.program_id(2) == pl.num_programs(2) - 1)
    def _():
        o_ref[...] = (acc_ref[...] + b_ref[...]).astype(o_ref.dtype)


def _pick_tile(dim, target, step):
    """Largest tile <= target (multiple of step) that evenly divides dim."""
    if dim <= target:
        return dim
    t = (target // step) * step
    while t >= step:
        if dim % t == 0:
            return t
        t -= step
    return dim


def linear_tiled(x, w_t, b, *, tm=256, tn=256, tk=512):
    """x: (N, Din) f32, w_t: (Din, Dout) bf16 (pre-transposed), b: (1, Dout)."""
    N, Din = x.shape
    Dout = w_t.shape[1]
    tm = _pick_tile(N, tm, 8)
    tn = _pick_tile(Dout, tn, 128)
    tk = _pick_tile(Din, tk, 128)
    grid = (N // tm, Dout // tn, Din // tk)

    cost = pl.CostEstimate(
        flops=2 * N * Din * Dout,
        transcendentals=0,
        bytes_accessed=4 * N * Din + 2 * Din * Dout + 4 * N * Dout + 4 * Dout)

    return pl.pallas_call(
        _linear_tiled_kernel,
        out_shape=jax.ShapeDtypeStruct((N, Dout), jnp.float32),
        grid=grid,
        in_specs=[
            pl.BlockSpec((tm, tk), lambda i, j, k: (i, k)),
            pl.BlockSpec((tk, tn), lambda i, j, k: (k, j)),
            pl.BlockSpec((1, tn), lambda i, j, k: (0, j)),
        ],
        out_specs=pl.BlockSpec((tm, tn), lambda i, j, k: (i, j)),
        scratch_shapes=[pltpu.VMEM((tm, tn), jnp.float32)],
        compiler_params=pltpu.CompilerParams(
            dimension_semantics=("parallel", "parallel", "arbitrary"),
            vmem_limit_bytes=32 * 1024 * 1024),
        cost_estimate=cost,
    )(x, w_t, b)


def _encoder_layer_kernel(x_ref, in_w_ref, in_b_ref, out_w_ref, out_b_ref,
                          l1_w_ref, l1_b_ref, l2_w_ref, l2_b_ref,
                          n1_g_ref, n1_b_ref, n2_g_ref, n2_b_ref,
                          o_ref, *, nhead, eps):
    """One fused TransformerEncoderLayer for a single batch element."""
    x = x_ref[0]                                   # (S, E) f32
    S, E = x.shape
    dh = E // nhead
    scale = 1.0 / math.sqrt(dh)

    in_w = in_w_ref[...]                           # (E, 3E) bf16
    cdt = in_w.dtype                               # MXU compute dtype

    # --- fused QKV projection (f32 accumulation) ---
    qkv = jnp.dot(x.astype(cdt), in_w,
                  preferred_element_type=jnp.float32) + in_b_ref[...]
    q = qkv[:, :E] * scale                         # fold 1/sqrt(dh) into q
    k = qkv[:, E:2 * E]
    v = qkv[:, 2 * E:]

    # --- causal mask built in-kernel (no HBM (S,S) mask input) ---
    row = jax.lax.broadcasted_iota(jnp.int32, (S, S), 0)
    col = jax.lax.broadcasted_iota(jnp.int32, (S, S), 1)
    causal = col <= row

    # --- per-head attention, all intermediates stay in VMEM ---
    heads = []
    for h in range(nhead):
        sl = slice(h * dh, (h + 1) * dh)
        qh = q[:, sl].astype(cdt)
        kh = k[:, sl].astype(cdt)
        vh = v[:, sl].astype(cdt)
        # contract the dh axis directly (no explicit k.T materialization)
        s = jax.lax.dot_general(qh, kh, (((1,), (1,)), ((), ())),
                                preferred_element_type=jnp.float32)
        s = jnp.where(causal, s, -1e30)
        m = jnp.max(s, axis=-1, keepdims=True)
        p = jnp.exp(s - m)
        denom = jnp.sum(p, axis=-1, keepdims=True)
        p = p * pl.reciprocal(denom, approx=True)  # EUP slot, keeps VALU free
        heads.append(jnp.dot(p.astype(cdt), vh,
                             preferred_element_type=jnp.float32))
    attn = jnp.concatenate(heads, axis=-1)         # (S, E) lane-dense

    attn = jnp.dot(attn.astype(cdt), out_w_ref[...],
                   preferred_element_type=jnp.float32) + out_b_ref[...]

    # --- residual + LayerNorm1 (f32 statistics) ---
    x1 = x + attn
    mu = jnp.mean(x1, axis=-1, keepdims=True)
    var = jnp.mean((x1 - mu) ** 2, axis=-1, keepdims=True)
    x1 = (x1 - mu) * jax.lax.rsqrt(var + eps) * n1_g_ref[...] + n1_b_ref[...]

    # --- feed-forward (relu) ---
    h1 = jnp.dot(x1.astype(cdt), l1_w_ref[...],
                 preferred_element_type=jnp.float32) + l1_b_ref[...]
    h1 = jnp.maximum(h1, 0.0)
    h2 = jnp.dot(h1.astype(cdt), l2_w_ref[...],
                 preferred_element_type=jnp.float32) + l2_b_ref[...]

    # --- residual + LayerNorm2 ---
    x2 = x1 + h2
    mu2 = jnp.mean(x2, axis=-1, keepdims=True)
    var2 = jnp.mean((x2 - mu2) ** 2, axis=-1, keepdims=True)
    o_ref[0] = ((x2 - mu2) * jax.lax.rsqrt(var2 + eps)
                * n2_g_ref[...] + n2_b_ref[...]).astype(o_ref.dtype)


def encoder_layer(x, p, nhead, eps=1e-5):
    """One TransformerEncoderLayer as a single fused pallas_call. x: (B,S,E)."""
    B, S, E = x.shape
    nhid = p["l1_w_t"].shape[1]

    def full(shape):
        return pl.BlockSpec(shape, lambda *_: (0,) * len(shape))

    flops = B * (2 * S * E * (4 * E + 2 * nhid) + 4 * S * S * E)
    bytes_w = 2 * (4 * E * E + 2 * E * nhid)
    bytes_x = 4 * 2 * B * S * E
    cost = pl.CostEstimate(flops=flops, transcendentals=B * nhead * S * S,
                           bytes_accessed=bytes_w + bytes_x)

    return pl.pallas_call(
        functools.partial(_encoder_layer_kernel, nhead=nhead, eps=eps),
        out_shape=jax.ShapeDtypeStruct((B, S, E), jnp.float32),
        grid=(B,),
        in_specs=[
            pl.BlockSpec((1, S, E), lambda b: (b, 0, 0)),
            full((E, 3 * E)), full((1, 3 * E)),
            full((E, E)), full((1, E)),
            full((E, nhid)), full((1, nhid)),
            full((nhid, E)), full((1, E)),
            full((1, E)), full((1, E)),
            full((1, E)), full((1, E)),
        ],
        out_specs=pl.BlockSpec((1, S, E), lambda b: (b, 0, 0)),
        compiler_params=pltpu.CompilerParams(
            dimension_semantics=("parallel",),
            vmem_limit_bytes=32 * 1024 * 1024),
        cost_estimate=cost,
    )(x, p["in_w_t"], p["in_b"], p["out_w_t"], p["out_b"],
      p["l1_w_t"], p["l1_b"], p["l2_w_t"], p["l2_b"],
      p["n1_g"], p["n1_b"], p["n2_g"], p["n2_b"])


# ------------------------------ model pieces -------------------------------

def make_positional_encoding(max_len, d_model):
    position = jnp.arange(max_len, dtype=jnp.float32)[:, None]
    div_term = jnp.exp(
        jnp.arange(0, d_model, 2, dtype=jnp.float32) * (-math.log(10000.0) / d_model)
    )
    pe = jnp.zeros((max_len, d_model), jnp.float32)
    pe = pe.at[:, 0::2].set(jnp.sin(position * div_term))
    pe = pe.at[:, 1::2].set(jnp.cos(position * div_term))
    return pe[:, None, :]  # (max_len, 1, d_model)


def transformer_model_forward(src_tokens, params, nhead):
    """src_tokens: (S, B) int32 -> logits (S, B, ntoken)."""
    S, B = src_tokens.shape
    E = params["emb"].shape[1]

    # embedding lookup * sqrt(ninp) + positional encoding, in (B, S, E) layout.
    # TODO(synk): data-dependent embedding gather kept as XLA glue (no clean
    # BlockSpec form); everything downstream runs in Pallas.
    x = jnp.take(params["emb"], src_tokens.T, axis=0) * math.sqrt(E)   # (B, S, E)
    x = x + params["pe"][:S, 0, :][None]                               # (1, S, E)

    for lp in params["layers"]:
        x = encoder_layer(x, lp, nhead)                                # fused layer

    logits = linear_tiled(x.reshape(B * S, E), params["dec_w_t"], params["dec_b"])
    return logits.reshape(B, S, -1).transpose(1, 0, 2)                 # (S, B, ntoken)


# ----------------------------- parameter init ------------------------------

def init_params(key, ntoken, ninp, nhead, nhid, nlayers, max_len=64):
    wdt = jnp.bfloat16  # MXU-native storage for matmul weights (f32 accumulation)
    keys = jax.random.split(key, 2 + nlayers)
    params = {
        "emb": jax.random.uniform(keys[0], (ntoken, ninp), jnp.float32, -0.1, 0.1),
        # decoder weight pre-transposed once here (no .T in the forward pass)
        "dec_w_t": jax.random.uniform(keys[1], (ntoken, ninp), jnp.float32,
                                      -0.1, 0.1).T.astype(wdt),
        "dec_b": jnp.zeros((1, ntoken), jnp.float32),
        "pe": make_positional_encoding(max_len, ninp),
        "layers": [],
    }
    for l in range(nlayers):
        lk = jax.random.split(keys[2 + l], 4)
        params["layers"].append({
            "in_w_t": (0.05 * jax.random.normal(lk[0], (3 * ninp, ninp))).T.astype(wdt),
            "in_b": jnp.zeros((1, 3 * ninp), jnp.float32),
            "out_w_t": (0.05 * jax.random.normal(lk[1], (ninp, ninp))).T.astype(wdt),
            "out_b": jnp.zeros((1, ninp), jnp.float32),
            "l1_w_t": (0.05 * jax.random.normal(lk[2], (nhid, ninp))).T.astype(wdt),
            "l1_b": jnp.zeros((1, nhid), jnp.float32),
            "l2_w_t": (0.05 * jax.random.normal(lk[3], (ninp, nhid))).T.astype(wdt),
            "l2_b": jnp.zeros((1, ninp), jnp.float32),
            "n1_g": jnp.ones((1, ninp), jnp.float32),
            "n1_b": jnp.zeros((1, ninp), jnp.float32),
            "n2_g": jnp.ones((1, ninp), jnp.float32),
            "n2_b": jnp.zeros((1, ninp), jnp.float32),
        })
    return params


# ---------------------------------- main -----------------------------------

if __name__ == "__main__":
    # small config consistent with TransformerModel(ntoken, ninp, nhead, nhid, nlayers)
    ntoken, ninp, nhead, nhid, nlayers = 50, 32, 4, 64, 2
    S, B = 8, 2

    key = jax.random.PRNGKey(0)
    pkey, dkey = jax.random.split(key)
    params = init_params(pkey, ntoken, ninp, nhead, nhid, nlayers)
    src = jax.random.randint(dkey, (S, B), 0, ntoken, dtype=jnp.int32)

    fwd = jax.jit(functools.partial(transformer_model_forward, nhead=nhead))
    logits = fwd(src, params)
    jax.block_until_ready(logits)

    assert logits.shape == (S, B, ntoken)
    assert bool(jnp.all(jnp.isfinite(logits)))
    print("KERNEL_OK")
</pallas_src>

<mosaic_0001>
module attributes {stable_mosaic.version = 11 : i64} {
  func.func @_linear_tiled_kernel(%arg0: i32, %arg1: i32, %arg2: i32, %arg3: memref<16x32xf32, #tpu.memory_space<vmem>>, %arg4: memref<32x50xbf16, #tpu.memory_space<vmem>>, %arg5: memref<1x50xf32, #tpu.memory_space<vmem>>, %arg6: memref<16x50xf32, #tpu.memory_space<vmem>>, %arg7: memref<16x50xf32, #tpu.memory_space<vmem>>) attributes {dimension_semantics = [#tpu.dimension_semantics<parallel>, #tpu.dimension_semantics<parallel>, #tpu.dimension_semantics<arbitrary>], iteration_bounds = array<i64: 1, 1, 1>, scalar_prefetch = 0 : i64, scratch_operands = 1 : i64, tpu.core_type = #tpu.core_type<tc>, window_params = [{transform_indices = @transform_0, window_bounds = array<i64: 16, 32>}, {transform_indices = @transform_1, window_bounds = array<i64: 32, 50>}, {transform_indices = @transform_2, window_bounds = array<i64: 1, 50>}, {transform_indices = @transform_3, window_bounds = array<i64: 16, 50>}]} {
    %c0_i32 = arith.constant 0 : i32
    %0 = arith.cmpi eq, %arg2, %c0_i32 : i32
    %1 = arith.extui %0 : i1 to i32
    %c0_i32_0 = arith.constant 0 : i32
    %2 = arith.cmpi ne, %1, %c0_i32_0 : i32
    scf.if %2 {
      %cst_10 = arith.constant 0.000000e+00 : f32
      %13 = vector.broadcast %cst_10 : f32 to vector<16x50xf32>
      %c0_11 = arith.constant 0 : index
      %c0_12 = arith.constant 0 : index
      %14 = vector.load %arg7[%c0_11, %c0_12] : memref<16x50xf32, #tpu.memory_space<vmem>>, vector<16x50xf32>
      tpu.vector_store %arg7[%c0_11, %c0_12], %13 {strides = array<i32>} : memref<16x50xf32, #tpu.memory_space<vmem>>, vector<16x50xf32>,
    } else {
    }
    %c0 = arith.constant 0 : index
    %c0_1 = arith.constant 0 : index
    %3 = vector.load %arg4[%c0, %c0_1] : memref<32x50xbf16, #tpu.memory_space<vmem>>, vector<32x50xbf16>
    %c0_2 = arith.constant 0 : index
    %c0_3 = arith.constant 0 : index
    %4 = vector.load %arg7[%c0_2, %c0_3] : memref<16x50xf32, #tpu.memory_space<vmem>>, vector<16x50xf32>
    %c0_4 = arith.constant 0 : index
    %c0_5 = arith.constant 0 : index
    %5 = vector.load %arg3[%c0_4, %c0_5] : memref<16x32xf32, #tpu.memory_space<vmem>>, vector<16x32xf32>
    %6 = arith.truncf %5 : vector<16x32xf32> to vector<16x32xbf16>
    %cst = arith.constant dense<0.000000e+00> : vector<16x50xf32>
    %7 = tpu.matmul %6, %3, %cst {dimension_numbers = #tpu.dot_dimension_numbers<[1], [0], [0], [1], [0, 0, 1, 1], [], []>} : vector<16x32xbf16>, vector<32x50xbf16>, vector<16x50xf32> -> vector<16x50xf32>
    %8 = arith.addf %4, %7 : vector<16x50xf32>
    %c0_6 = arith.constant 0 : index
    %c0_7 = arith.constant 0 : index
    %9 = vector.load %arg7[%c0_6, %c0_7] : memref<16x50xf32, #tpu.memory_space<vmem>>, vector<16x50xf32>
    tpu.vector_store %arg7[%c0_6, %c0_7], %8 {strides = array<i32>} : memref<16x50xf32, #tpu.memory_space<vmem>>, vector<16x50xf32>,
    %c0_i32_8 = arith.constant 0 : i32
    %10 = arith.cmpi eq, %arg2, %c0_i32_8 : i32
    %11 = arith.extui %10 : i1 to i32
    %c0_i32_9 = arith.constant 0 : i32
    %12 = arith.cmpi ne, %11, %c0_i32_9 : i32
    scf.if %12 {
      %c0_10 = arith.constant 0 : index
      %c0_11 = arith.constant 0 : index
      %13 = vector.load %arg7[%c0_10, %c0_11] : memref<16x50xf32, #tpu.memory_space<vmem>>, vector<16x50xf32>
      %c0_12 = arith.constant 0 : index
      %c0_13 = arith.constant 0 : index
      %14 = vector.load %arg5[%c0_12, %c0_13] : memref<1x50xf32, #tpu.memory_space<vmem>>, vector<1x50xf32>
      %15 = vector.broadcast %14 : vector<1x50xf32> to vector<16x50xf32>
      %16 = arith.addf %13, %15 : vector<16x50xf32>
      %c0_14 = arith.constant 0 : index
      %c0_15 = arith.constant 0 : index
      %17 = vector.load %arg6[%c0_14, %c0_15] : memref<16x50xf32, #tpu.memory_space<vmem>>, vector<16x50xf32>
      tpu.vector_store %arg6[%c0_14, %c0_15], %16 {strides = array<i32>} : memref<16x50xf32, #tpu.memory_space<vmem>>, vector<16x50xf32>,
    } else {
    }
    return
  }
  func.func @transform_0(%arg0: i32, %arg1: i32, %arg2: i32) -> (i32, i32) {
    %c0_i32 = arith.constant 0 : i32
    return %arg0, %arg2 : i32, i32
  }
  func.func @transform_1(%arg0: i32, %arg1: i32, %arg2: i32) -> (i32, i32) {
    %c0_i32 = arith.constant 0 : i32
    return %arg2, %arg1 : i32, i32
  }
  func.func @transform_2(%arg0: i32, %arg1: i32, %arg2: i32) -> (i32, i32) {
    %c0_i32 = arith.constant 0 : i32
    %c0_i32_0 = arith.constant 0 : i32
    return %c0_i32, %arg1 : i32, i32
  }
  func.func @transform_3(%arg0: i32, %arg1: i32, %arg2: i32) -> (i32, i32) {
    %c0_i32 = arith.constant 0 : i32
    return %arg0, %arg1 : i32, i32
  }
}

module attributes {stable_mosaic.version = 11 : i64} {
  func.func @_encoder_layer_kernel(%arg0: i32, %arg1: memref<1x8x32xf32, #tpu.memory_space<vmem>>, %arg2: memref<32x96xbf16, #tpu.memory_space<vmem>>, %arg3: memref<1x96xf32, #tpu.memory_space<vmem>>, %arg4: memref<32x32xbf16, #tpu.memory_space<vmem>>, %arg5: memref<1x32xf32, #tpu.memory_space<vmem>>, %arg6: memref<32x64xbf16, #tpu.memory_space<vmem>>, %arg7: memref<1x64xf32, #tpu.memory_space<vmem>>, %arg8: memref<64x32xbf16, #tpu.memory_space<vmem>>, %arg9: memref<1x32xf32, #tpu.memory_space<vmem>>, %arg10: memref<1x32xf32, #tpu.memory_space<vmem>>, %arg11: memref<1x32xf32, #tpu.memory_space<vmem>>, %arg12: memref<1x32xf32, #tpu.memory_space<vmem>>, %arg13: memref<1x32xf32, #tpu.memory_space<vmem>>, %arg14: memref<1x8x32xf32, #tpu.memory_space<vmem>>) attributes {dimension_semantics = [#tpu.dimension_semantics<parallel>], iteration_bounds = array<i64: 2>, scalar_prefetch = 0 : i64, scratch_operands = 0 : i64, tpu.core_type = #tpu.core_type<tc>, window_params = [{transform_indices = @transform_0, window_bounds = array<i64: 1, 8, 32>}, {pipeline_mode = #tpu.pipeline_mode<synchronous>, transform_indices = @transform_1, window_bounds = array<i64: 32, 96>}, {pipeline_mode = #tpu.pipeline_mode<synchronous>, transform_indices = @transform_2, window_bounds = array<i64: 1, 96>}, {pipeline_mode = #tpu.pipeline_mode<synchronous>, transform_indices = @transform_3, window_bounds = array<i64: 32, 32>}, {pipeline_mode = #tpu.pipeline_mode<synchronous>, transform_indices = @transform_4, window_bounds = array<i64: 1, 32>}, {pipeline_mode = #tpu.pipeline_mode<synchronous>, transform_indices = @transform_5, window_bounds = array<i64: 32, 64>}, {pipeline_mode = #tpu.pipeline_mode<synchronous>, transform_indices = @transform_6, window_bounds = array<i64: 1, 64>}, {pipeline_mode = #tpu.pipeline_mode<synchronous>, transform_indices = @transform_7, window_bounds = array<i64: 64, 32>}, {pipeline_mode = #tpu.pipeline_mode<synchronous>, transform_indices = @transform_8, window_bounds = array<i64: 1, 32>}, {pipeline_mode = #tpu.pipeline_mode<synchronous>, transform_indices = @transform_9, window_bounds = array<i64: 1, 32>}, {pipeline_mode = #tpu.pipeline_mode<synchronous>, transform_indices = @transform_10, window_bounds = array<i64: 1, 32>}, {pipeline_mode = #tpu.pipeline_mode<synchronous>, transform_indices = @transform_11, window_bounds = array<i64: 1, 32>}, {pipeline_mode = #tpu.pipeline_mode<synchronous>, transform_indices = @transform_12, window_bounds = array<i64: 1, 32>}, {transform_indices = @transform_13, window_bounds = array<i64: 1, 8, 32>}]} {
    %c0 = arith.constant 0 : index
    %c0_0 = arith.constant 0 : index
    %c0_1 = arith.constant 0 : index
    %0 = vector.load %arg1[%c0, %c0_0, %c0_1] : memref<1x8x32xf32, #tpu.memory_space<vmem>>, vector<1x8x32xf32>
    %1 = vector.shape_cast %0 : vector<1x8x32xf32> to vector<8x32xf32>
    %c0_2 = arith.constant 0 : index
    %c0_3 = arith.constant 0 : index
    %2 = vector.load %arg2[%c0_2, %c0_3] : memref<32x96xbf16, #tpu.memory_space<vmem>>, vector<32x96xbf16>
    %3 = arith.truncf %1 : vector<8x32xf32> to vector<8x32xbf16>
    %cst = arith.constant dense<0.000000e+00> : vector<8x96xf32>
    %4 = tpu.matmul %3, %2, %cst {dimension_numbers = #tpu.dot_dimension_numbers<[1], [0], [0], [1], [0, 0, 1, 1], [], []>} : vector<8x32xbf16>, vector<32x96xbf16>, vector<8x96xf32> -> vector<8x96xf32>
    %c0_4 = arith.constant 0 : index
    %c0_5 = arith.constant 0 : index
    %5 = vector.load %arg3[%c0_4, %c0_5] : memref<1x96xf32, #tpu.memory_space<vmem>>, vector<1x96xf32>
    %6 = vector.broadcast %5 : vector<1x96xf32> to vector<8x96xf32>
    %7 = arith.addf %4, %6 : vector<8x96xf32>
    %8 = vector.extract_strided_slice %7 {offsets = [0, 0], sizes = [8, 32], strides = [1, 1]} : vector<8x96xf32> to vector<8x32xf32>
    %cst_6 = arith.constant 0.353553385 : f32
    %9 = vector.broadcast %cst_6 : f32 to vector<8x32xf32>
    %10 = arith.mulf %8, %9 : vector<8x32xf32>
    %11 = vector.extract_strided_slice %7 {offsets = [0, 32], sizes = [8, 32], strides = [1, 1]} : vector<8x96xf32> to vector<8x32xf32>
    %12 = vector.extract_strided_slice %7 {offsets = [0, 64], sizes = [8, 32], strides = [1, 1]} : vector<8x96xf32> to vector<8x32xf32>
    %13 = tpu.iota {dimensions = array<i32: 0>} : vector<8x8xi32>
    %14 = tpu.iota {dimensions = array<i32: 1>} : vector<8x8xi32>
    %15 = arith.cmpi sle, %14, %13 : vector<8x8xi32>
    %16 = vector.extract_strided_slice %10 {offsets = [0, 0], sizes = [8, 8], strides = [1, 1]} : vector<8x32xf32> to vector<8x8xf32>
    %17 = arith.truncf %16 : vector<8x8xf32> to vector<8x8xbf16>
    %18 = vector.extract_strided_slice %11 {offsets = [0, 0], sizes = [8, 8], strides = [1, 1]} : vector<8x32xf32> to vector<8x8xf32>
    %19 = arith.truncf %18 : vector<8x8xf32> to vector<8x8xbf16>
    %20 = vector.extract_strided_slice %12 {offsets = [0, 0], sizes = [8, 8], strides = [1, 1]} : vector<8x32xf32> to vector<8x8xf32>
    %21 = arith.truncf %20 : vector<8x8xf32> to vector<8x8xbf16>
    %cst_7 = arith.constant dense<0.000000e+00> : vector<8x8xf32>
    %22 = tpu.matmul %17, %19, %cst_7 {dimension_numbers = #tpu.dot_dimension_numbers<[1], [1], [0], [0], [0, 0, 1, 0], [], []>} : vector<8x8xbf16>, vector<8x8xbf16>, vector<8x8xf32> -> vector<8x8xf32>
    %cst_8 = arith.constant -1.000000e+30 : f32
    %23 = vector.broadcast %cst_8 : f32 to vector<8x8xf32>
    %24 = arith.select %15, %22, %23 : vector<8x8xi1>, vector<8x8xf32>
    %cst_9 = arith.constant dense<0xFF800000> : vector<8xf32>
    %25 = vector.multi_reduction <maximumf>, %24, %cst_9 [1] : vector<8x8xf32> to vector<8xf32>
    %26 = vector.shape_cast %25 : vector<8xf32> to vector<8x1xf32>
    %27 = vector.broadcast %26 : vector<8x1xf32> to vector<8x8xf32>
    %28 = arith.subf %24, %27 : vector<8x8xf32>
    %29 = math.exp %28 : vector<8x8xf32>
    %cst_10 = arith.constant dense<0.000000e+00> : vector<8xf32>
    %30 = vector.multi_reduction <add>, %29, %cst_10 [1] : vector<8x8xf32> to vector<8xf32>
    %31 = vector.shape_cast %30 : vector<8xf32> to vector<8x1xf32>
    %32 = tpu.reciprocal %31 {approx = true} : vector<8x1xf32> -> vector<8x1xf32>
    %33 = vector.broadcast %32 : vector<8x1xf32> to vector<8x8xf32>
    %34 = arith.mulf %29, %33 : vector<8x8xf32>
    %35 = arith.truncf %34 : vector<8x8xf32> to vector<8x8xbf16>
    %cst_11 = arith.constant dense<0.000000e+00> : vector<8x8xf32>
    %36 = tpu.matmul %35, %21, %cst_11 {dimension_numbers = #tpu.dot_dimension_numbers<[1], [0], [0], [1], [0, 0, 1, 1], [], []>} : vector<8x8xbf16>, vector<8x8xbf16>, vector<8x8xf32> -> vector<8x8xf32>
    %37 = vector.extract_strided_slice %10 {offsets = [0, 8], sizes = [8, 8], strides = [1, 1]} : vector<8x32xf32> to vector<8x8xf32>
    %38 = arith.truncf %37 : vector<8x8xf32> to vector<8x8xbf16>
    %39 = vector.extract_strided_slice %11 {offsets = [0, 8], sizes = [8, 8], strides = [1, 1]} : vector<8x32xf32> to vector<8x8xf32>
    %40 = arith.truncf %39 : vector<8x8xf32> to vector<8x8xbf16>
    %41 = vector.extract_strided_slice %12 {offsets = [0, 8], sizes = [8, 8], strides = [1, 1]} : vector<8x32xf32> to vector<8x8xf32>
    %42 = arith.truncf %41 : vector<8x8xf32> to vector<8x8xbf16>
    %cst_12 = arith.constant dense<0.000000e+00> : vector<8x8xf32>
    %43 = tpu.matmul %38, %40, %cst_12 {dimension_numbers = #tpu.dot_dimension_numbers<[1], [1], [0], [0], [0, 0, 1, 0], [], []>} : vector<8x8xbf16>, vector<8x8xbf16>, vector<8x8xf32> -> vector<8x8xf32>
    %cst_13 = arith.constant -1.000000e+30 : f32
    %44 = vector.broadcast %cst_13 : f32 to vector<8x8xf32>
    %45 = arith.select %15, %43, %44 : vector<8x8xi1>, vector<8x8xf32>
    %cst_14 = arith.constant dense<0xFF800000> : vector<8xf32>
    %46 = vector.multi_reduction <maximumf>, %45, %cst_14 [1] : vector<8x8xf32> to vector<8xf32>
    %47 = vector.shape_cast %46 : vector<8xf32> to vector<8x1xf32>
    %48 = vector.broadcast %47 : vector<8x1xf32> to vector<8x8xf32>
    %49 = arith.subf %45, %48 : vector<8x8xf32>
    %50 = math.exp %49 : vector<8x8xf32>
    %cst_15 = arith.constant dense<0.000000e+00> : vector<8xf32>
    %51 = vector.multi_reduction <add>, %50, %cst_15 [1] : vector<8x8xf32> to vector<8xf32>
    %52 = vector.shape_cast %51 : vector<8xf32> to vector<8x1xf32>
    %53 = tpu.reciprocal %52 {approx = true} : vector<8x1xf32> -> vector<8x1xf32>
    %54 = vector.broadcast %53 : vector<8x1xf32> to vector<8x8xf32>
    %55 = arith.mulf %50, %54 : vector<8x8xf32>
    %56 = arith.truncf %55 : vector<8x8xf32> to vector<8x8xbf16>
    %cst_16 = arith.constant dense<0.000000e+00> : vector<8x8xf32>
    %57 = tpu.matmul %56, %42, %cst_16 {dimension_numbers = #tpu.dot_dimension_numbers<[1], [0], [0], [1], [0, 0, 1, 1], [], []>} : vector<8x8xbf16>, vector<8x8xbf16>, vector<8x8xf32> -> vector<8x8xf32>
    %58 = vector.extract_strided_slice %10 {offsets = [0, 16], sizes = [8, 8], strides = [1, 1]} : vector<8x32xf32> to vector<8x8xf32>
    %59 = arith.truncf %58 : vector<8x8xf32> to vector<8x8xbf16>
    %60 = vector.extract_strided_slice %11 {offsets = [0, 16], sizes = [8, 8], strides = [1, 1]} : vector<8x32xf32> to vector<8x8xf32>
    %61 = arith.truncf %60 : vector<8x8xf32> to vector<8x8xbf16>
    %62 = vector.extract_strided_slice %12 {offsets = [0, 16], sizes = [8, 8], strides = [1, 1]} : vector<8x32xf32> to vector<8x8xf32>
    %63 = arith.truncf %62 : vector<8x8xf32> to vector<8x8xbf16>
    %cst_17 = arith.constant dense<0.000000e+00> : vector<8x8xf32>
    %64 = tpu.matmul %59, %61, %cst_17 {dimension_numbers = #tpu.dot_dimension_numbers<[1], [1], [0], [0], [0, 0, 1, 0], [], []>} : vector<8x8xbf16>, vector<8x8xbf16>, vector<8x8xf32> -> vector<8x8xf32>
    %cst_18 = arith.constant -1.000000e+30 : f32
    %65 = vector.broadcast %cst_18 : f32 to vector<8x8xf32>
    %66 = arith.select %15, %64, %65 : vector<8x8xi1>, vector<8x8xf32>
    %cst_19 = arith.constant dense<0xFF800000> : vector<8xf32>
    %67 = vector.multi_reduction <maximumf>, %66, %cst_19 [1] : vector<8x8xf32> to vector<8xf32>
    %68 = vector.shape_cast %67 : vector<8xf32> to vector<8x1xf32>
    %69 = vector.broadcast %68 : vector<8x1xf32> to vector<8x8xf32>
    %70 = arith.subf %66, %69 : vector<8x8xf32>
    %71 = math.exp %70 : vector<8x8xf32>
    %cst_20 = arith.constant dense<0.000000e+00> : vector<8xf32>
    %72 = vector.multi_reduction <add>, %71, %cst_20 [1] : vector<8x8xf32> to vector<8xf32>
    %73 = vector.shape_cast %72 : vector<8xf32> to vector<8x1xf32>
    %74 = tpu.reciprocal %73 {approx = true} : vector<8x1xf32> -> vector<8x1xf32>
    %75 = vector.broadcast %74 : vector<8x1xf32> to vector<8x8xf32>
    %76 = arith.mulf %71, %75 : vector<8x8xf32>
    %77 = arith.truncf %76 : vector<8x8xf32> to vector<8x8xbf16>
    %cst_21 = arith.constant dense<0.000000e+00> : vector<8x8xf32>
    %78 = tpu.matmul %77, %63, %cst_21 {dimension_numbers = #tpu.dot_dimension_numbers<[1], [0], [0], [1], [0, 0, 1, 1], [], []>} : vector<8x8xbf16>, vector<8x8xbf16>, vector<8x8xf32> -> vector<8x8xf32>
    %79 = vector.extract_strided_slice %10 {offsets = [0, 24], sizes = [8, 8], strides = [1, 1]} : vector<8x32xf32> to vector<8x8xf32>
    %80 = arith.truncf %79 : vector<8x8xf32> to vector<8x8xbf16>
    %81 = vector.extract_strided_slice %11 {offsets = [0, 24], sizes = [8, 8], strides = [1, 1]} : vector<8x32xf32> to vector<8x8xf32>
    %82 = arith.truncf %81 : vector<8x8xf32> to vector<8x8xbf16>
    %83 = vector.extract_strided_slice %12 {offsets = [0, 24], sizes = [8, 8], strides = [1, 1]} : vector<8x32xf32> to vector<8x8xf32>
    %84 = arith.truncf %83 : vector<8x8xf32> to vector<8x8xbf16>
    %cst_22 = arith.constant dense<0.000000e+00> : vector<8x8xf32>
    %85 = tpu.matmul %80, %82, %cst_22 {dimension_numbers = #tpu.dot_dimension_numbers<[1], [1], [0], [0], [0, 0, 1, 0], [], []>} : vector<8x8xbf16>, vector<8x8xbf16>, vector<8x8xf32> -> vector<8x8xf32>
    %cst_23 = arith.constant -1.000000e+30 : f32
    %86 = vector.broadcast %cst_23 : f32 to vector<8x8xf32>
    %87 = arith.select %15, %85, %86 : vector<8x8xi1>, vector<8x8xf32>
    %cst_24 = arith.constant dense<0xFF800000> : vector<8xf32>
    %88 = vector.multi_reduction <maximumf>, %87, %cst_24 [1] : vector<8x8xf32> to vector<8xf32>
    %89 = vector.shape_cast %88 : vector<8xf32> to vector<8x1xf32>
    %90 = vector.broadcast %89 : vector<8x1xf32> to vector<8x8xf32>
    %91 = arith.subf %87, %90 : vector<8x8xf32>
    %92 = math.exp %91 : vector<8x8xf32>
    %cst_25 = arith.constant dense<0.000000e+00> : vector<8xf32>
    %93 = vector.multi_reduction <add>, %92, %cst_25 [1] : vector<8x8xf32> to vector<8xf32>
    %94 = vector.shape_cast %93 : vector<8xf32> to vector<8x1xf32>
    %95 = tpu.reciprocal %94 {approx = true} : vector<8x1xf32> -> vector<8x1xf32>
    %96 = vector.broadcast %95 : vector<8x1xf32> to vector<8x8xf32>
    %97 = arith.mulf %92, %96 : vector<8x8xf32>
    %98 = arith.truncf %97 : vector<8x8xf32> to vector<8x8xbf16>
    %cst_26 = arith.constant dense<0.000000e+00> : vector<8x8xf32>
    %99 = tpu.matmul %98, %84, %cst_26 {dimension_numbers = #tpu.dot_dimension_numbers<[1], [0], [0], [1], [0, 0, 1, 1], [], []>} : vector<8x8xbf16>, vector<8x8xbf16>, vector<8x8xf32> -> vector<8x8xf32>
    %100 = tpu.concatenate %36, %57, %78, %99 in 1 : vector<8x8xf32>, vector<8x8xf32>, vector<8x8xf32>, vector<8x8xf32> -> vector<8x32xf32>
    %101 = arith.truncf %100 : vector<8x32xf32> to vector<8x32xbf16>
    %c0_27 = arith.constant 0 : index
    %c0_28 = arith.constant 0 : index
    %102 = vector.load %arg4[%c0_27, %c0_28] : memref<32x32xbf16, #tpu.memory_space<vmem>>, vector<32x32xbf16>
    %cst_29 = arith.constant dense<0.000000e+00> : vector<8x32xf32>
    %103 = tpu.matmul %101, %102, %cst_29 {dimension_numbers = #tpu.dot_dimension_numbers<[1], [0], [0], [1], [0, 0, 1, 1], [], []>} : vector<8x32xbf16>, vector<32x32xbf16>, vector<8x32xf32> -> vector<8x32xf32>
    %c0_30 = arith.constant 0 : index
    %c0_31 = arith.constant 0 : index
    %104 = vector.load %arg5[%c0_30, %c0_31] : memref<1x32xf32, #tpu.memory_space<vmem>>, vector<1x32xf32>
    %105 = vector.broadcast %104 : vector<1x32xf32> to vector<8x32xf32>
    %106 = arith.addf %103, %105 : vector<8x32xf32>
    %107 = arith.addf %1, %106 : vector<8x32xf32>
    %cst_32 = arith.constant dense<0.000000e+00> : vector<8xf32>
    %108 = vector.multi_reduction <add>, %107, %cst_32 [1] : vector<8x32xf32> to vector<8xf32>
    %109 = vector.shape_cast %108 : vector<8xf32> to vector<8x1xf32>
    %cst_33 = arith.constant 3.200000e+01 : f32
    %110 = vector.broadcast %cst_33 : f32 to vector<8x1xf32>
    %111 = arith.divf %109, %110 : vector<8x1xf32>
    %112 = vector.broadcast %111 : vector<8x1xf32> to vector<8x32xf32>
    %113 = arith.subf %107, %112 : vector<8x32xf32>
    %114 = arith.mulf %113, %113 : vector<8x32xf32>
    %cst_34 = arith.constant dense<0.000000e+00> : vector<8xf32>
    %115 = vector.multi_reduction <add>, %114, %cst_34 [1] : vector<8x32xf32> to vector<8xf32>
    %116 = vector.shape_cast %115 : vector<8xf32> to vector<8x1xf32>
    %cst_35 = arith.constant 3.200000e+01 : f32
    %117 = vector.broadcast %cst_35 : f32 to vector<8x1xf32>
    %118 = arith.divf %116, %117 : vector<8x1xf32>
    %119 = vector.broadcast %111 : vector<8x1xf32> to vector<8x32xf32>
    %120 = arith.subf %107, %119 : vector<8x32xf32>
    %cst_36 = arith.constant 9.99999974E-6 : f32
    %121 = vector.broadcast %cst_36 : f32 to vector<8x1xf32>
    %122 = arith.addf %118, %121 : vector<8x1xf32>
    %123 = math.rsqrt %122 : vector<8x1xf32>
    %124 = vector.broadcast %123 : vector<8x1xf32> to vector<8x32xf32>
    %125 = arith.mulf %120, %124 : vector<8x32xf32>
    %c0_37 = arith.constant 0 : index
    %c0_38 = arith.constant 0 : index
    %126 = vector.load %arg10[%c0_37, %c0_38] : memref<1x32xf32, #tpu.memory_space<vmem>>, vector<1x32xf32>
    %127 = vector.broadcast %126 : vector<1x32xf32> to vector<8x32xf32>
    %128 = arith.mulf %125, %127 : vector<8x32xf32>
    %c0_39 = arith.constant 0 : index
    %c0_40 = arith.constant 0 : index
    %129 = vector.load %arg11[%c0_39, %c0_40] : memref<1x32xf32, #tpu.memory_space<vmem>>, vector<1x32xf32>
    %130 = vector.broadcast %129 : vector<1x32xf32> to vector<8x32xf32>
    %131 = arith.addf %128, %130 : vector<8x32xf32>
    %132 = arith.truncf %131 : vector<8x32xf32> to vector<8x32xbf16>
    %c0_41 = arith.constant 0 : index
    %c0_42 = arith.constant 0 : index
    %133 = vector.load %arg6[%c0_41, %c0_42] : memref<32x64xbf16, #tpu.memory_space<vmem>>, vector<32x64xbf16>
    %cst_43 = arith.constant dense<0.000000e+00> : vector<8x64xf32>
    %134 = tpu.matmul %132, %133, %cst_43 {dimension_numbers = #tpu.dot_dimension_numbers<[1], [0], [0], [1], [0, 0, 1, 1], [], []>} : vector<8x32xbf16>, vector<32x64xbf16>, vector<8x64xf32> -> vector<8x64xf32>
    %c0_44 = arith.constant 0 : index
    %c0_45 = arith.constant 0 : index
    %135 = vector.load %arg7[%c0_44, %c0_45] : memref<1x64xf32, #tpu.memory_space<vmem>>, vector<1x64xf32>
    %136 = vector.broadcast %135 : vector<1x64xf32> to vector<8x64xf32>
    %137 = arith.addf %134, %136 : vector<8x64xf32>
    %cst_46 = arith.constant 0.000000e+00 : f32
    %138 = vector.broadcast %cst_46 : f32 to vector<8x64xf32>
    %139 = arith.maximumf %137, %138 : vector<8x64xf32>
    %140 = arith.truncf %139 : vector<8x64xf32> to vector<8x64xbf16>
    %c0_47 = arith.constant 0 : index
    %c0_48 = arith.constant 0 : index
    %141 = vector.load %arg8[%c0_47, %c0_48] : memref<64x32xbf16, #tpu.memory_space<vmem>>, vector<64x32xbf16>
    %cst_49 = arith.constant dense<0.000000e+00> : vector<8x32xf32>
    %142 = tpu.matmul %140, %141, %cst_49 {dimension_numbers = #tpu.dot_dimension_numbers<[1], [0], [0], [1], [0, 0, 1, 1], [], []>} : vector<8x64xbf16>, vector<64x32xbf16>, vector<8x32xf32> -> vector<8x32xf32>
    %c0_50 = arith.constant 0 : index
    %c0_51 = arith.constant 0 : index
    %143 = vector.load %arg9[%c0_50, %c0_51] : memref<1x32xf32, #tpu.memory_space<vmem>>, vector<1x32xf32>
    %144 = vector.broadcast %143 : vector<1x32xf32> to vector<8x32xf32>
    %145 = arith.addf %142, %144 : vector<8x32xf32>
    %146 = arith.addf %131, %145 : vector<8x32xf32>
    %cst_52 = arith.constant dense<0.000000e+00> : vector<8xf32>
    %147 = vector.multi_reduction <add>, %146, %cst_52 [1] : vector<8x32xf32> to vector<8xf32>
    %148 = vector.shape_cast %147 : vector<8xf32> to vector<8x1xf32>
    %cst_53 = arith.constant 3.200000e+01 : f32
    %149 = vector.broadcast %cst_53 : f32 to vector<8x1xf32>
    %150 = arith.divf %148, %149 : vector<8x1xf32>
    %151 = vector.broadcast %150 : vector<8x1xf32> to vector<8x32xf32>
    %152 = arith.subf %146, %151 : vector<8x32xf32>
    %153 = arith.mulf %152, %152 : vector<8x32xf32>
    %cst_54 = arith.constant dense<0.000000e+00> : vector<8xf32>
    %154 = vector.multi_reduction <add>, %153, %cst_54 [1] : vector<8x32xf32> to vector<8xf32>
    %155 = vector.shape_cast %154 : vector<8xf32> to vector<8x1xf32>
    %cst_55 = arith.constant 3.200000e+01 : f32
    %156 = vector.broadcast %cst_55 : f32 to vector<8x1xf32>
    %157 = arith.divf %155, %156 : vector<8x1xf32>
    %158 = vector.broadcast %150 : vector<8x1xf32> to vector<8x32xf32>
    %159 = arith.subf %146, %158 : vector<8x32xf32>
    %cst_56 = arith.constant 9.99999974E-6 : f32
    %160 = vector.broadcast %cst_56 : f32 to vector<8x1xf32>
    %161 = arith.addf %157, %160 : vector<8x1xf32>
    %162 = math.rsqrt %161 : vector<8x1xf32>
    %163 = vector.broadcast %162 : vector<8x1xf32> to vector<8x32xf32>
    %164 = arith.mulf %159, %163 : vector<8x32xf32>
    %c0_57 = arith.constant 0 : index
    %c0_58 = arith.constant 0 : index
    %165 = vector.load %arg12[%c0_57, %c0_58] : memref<1x32xf32, #tpu.memory_space<vmem>>, vector<1x32xf32>
    %166 = vector.broadcast %165 : vector<1x32xf32> to vector<8x32xf32>
    %167 = arith.mulf %164, %166 : vector<8x32xf32>
    %c0_59 = arith.constant 0 : index
    %c0_60 = arith.constant 0 : index
    %168 = vector.load %arg13[%c0_59, %c0_60] : memref<1x32xf32, #tpu.memory_space<vmem>>, vector<1x32xf32>
    %169 = vector.broadcast %168 : vector<1x32xf32> to vector<8x32xf32>
    %170 = arith.addf %167, %169 : vector<8x32xf32>
    %c0_61 = arith.constant 0 : index
    %c0_62 = arith.constant 0 : index
    %c0_63 = arith.constant 0 : index
    %171 = vector.load %arg14[%c0_61, %c0_62, %c0_63] : memref<1x8x32xf32, #tpu.memory_space<vmem>>, vector<1x8x32xf32>
    %172 = vector.shape_cast %171 : vector<1x8x32xf32> to vector<8x32xf32>
    %173 = vector.shape_cast %170 : vector<8x32xf32> to vector<1x8x32xf32>
    tpu.vector_store %arg14[%c0_61, %c0_62, %c0_63], %173 {strides = array<i32>} : memref<1x8x32xf32, #tpu.memory_space<vmem>>, vector<1x8x32xf32>,
    return
  }
  func.func @transform_0(%arg0: i32) -> (i32, i32, i32) {
    %c0_i32 = arith.constant 0 : i32
    %c0_i32_0 = arith.constant 0 : i32
    %c0_i32_1 = arith.constant 0 : i32
    return %arg0, %c0_i32, %c0_i32_0 : i32, i32, i32
  }
  func.func @transform_1(%arg0: i32) -> (i32, i32) {
    %c0_i32 = arith.constant 0 : i32
    %c0_i32_0 = arith.constant 0 : i32
    %c0_i32_1 = arith.constant 0 : i32
    return %c0_i32, %c0_i32_0 : i32, i32
  }
  func.func @transform_2(%arg0: i32) -> (i32, i32) {
    %c0_i32 = arith.constant 0 : i32
    %c0_i32_0 = arith.constant 0 : i32
    %c0_i32_1 = arith.constant 0 : i32
    return %c0_i32, %c0_i32_0 : i32, i32
  }
  func.func @transform_3(%arg0: i32) -> (i32, i32) {
    %c0_i32 = arith.constant 0 : i32
    %c0_i32_0 = arith.constant 0 : i32
    %c0_i32_1 = arith.constant 0 : i32
    return %c0_i32, %c0_i32_0 : i32, i32
  }
  func.func @transform_4(%arg0: i32) -> (i32, i32) {
    %c0_i32 = arith.constant 0 : i32
    %c0_i32_0 = arith.constant 0 : i32
    %c0_i32_1 = arith.constant 0 : i32
    return %c0_i32, %c0_i32_0 : i32, i32
  }
  func.func @transform_5(%arg0: i32) -> (i32, i32) {
    %c0_i32 = arith.constant 0 : i32
    %c0_i32_0 = arith.constant 0 : i32
    %c0_i32_1 = arith.constant 0 : i32
    return %c0_i32, %c0_i32_0 : i32, i32
  }
  func.func @transform_6(%arg0: i32) -> (i32, i32) {
    %c0_i32 = arith.constant 0 : i32
    %c0_i32_0 = arith.constant 0 : i32
    %c0_i32_1 = arith.constant 0 : i32
    return %c0_i32, %c0_i32_0 : i32, i32
  }
  func.func @transform_7(%arg0: i32) -> (i32, i32) {
    %c0_i32 = arith.constant 0 : i32
    %c0_i32_0 = arith.constant 0 : i32
    %c0_i32_1 = arith.constant 0 : i32
    return %c0_i32, %c0_i32_0 : i32, i32
  }
  func.func @transform_8(%arg0: i32) -> (i32, i32) {
    %c0_i32 = arith.constant 0 : i32
    %c0_i32_0 = arith.constant 0 : i32
    %c0_i32_1 = arith.constant 0 : i32
    return %c0_i32, %c0_i32_0 : i32, i32
  }
  func.func @transform_9(%arg0: i32) -> (i32, i32) {
    %c0_i32 = arith.constant 0 : i32
    %c0_i32_0 = arith.constant 0 : i32
    %c0_i32_1 = arith.constant 0 : i32
    return %c0_i32, %c0_i32_0 : i32, i32
  }
  func.func @transform_10(%arg0: i32) -> (i32, i32) {
    %c0_i32 = arith.constant 0 : i32
    %c0_i32_0 = arith.constant 0 : i32
    %c0_i32_1 = arith.constant 0 : i32
    return %c0_i32, %c0_i32_0 : i32, i32
  }
  func.func @transform_11(%arg0: i32) -> (i32, i32) {
    %c0_i32 = arith.constant 0 : i32
    %c0_i32_0 = arith.constant 0 : i32
    %c0_i32_1 = arith.constant 0 : i32
    return %c0_i32, %c0_i32_0 : i32, i32
  }
  func.func @transform_12(%arg0: i32) -> (i32, i32) {
    %c0_i32 = arith.constant 0 : i32
    %c0_i32_0 = arith.constant 0 : i32
    %c0_i32_1 = arith.constant 0 : i32
    return %c0_i32, %c0_i32_0 : i32, i32
  }
  func.func @transform_13(%arg0: i32) -> (i32, i32, i32) {
    %c0_i32 = arith.constant 0 : i32
    %c0_i32_0 = arith.constant 0 : i32
    %c0_i32_1 = arith.constant 0 : i32
    return %arg0, %c0_i32, %c0_i32_0 : i32, i32, i32
  }
}

</mosaic_0001>

<bundles_post_ra>
// kernel: transformer_model_forward.5
= control target key start
LH: loop header
LB: loop body
LE: loop exit
PB: predicated region body
PF: predicated region fallthrough
CT: control target
= control target key end

     0   :  { %vm19_vm0 = vcmask 408576   ;;  %v132_v0 = vmov 0.0   ;;  %vm133_vm1 = vmmov 0   ;;  %vm43_vm2 = vcmask 261120   ;;  %s181_s1 = inlined_call_operand.vmem [shape: bf16[32,50], index: 1, kind: input, shape index: {}]   ;;  %s182_s0 = inlined_call_operand.vmem [shape: f32[16,32], index: 0, kind: input, shape index: {}]   ;;  %s183_s2 = inlined_call_operand.vmem [shape: f32[1,50], index: 2, kind: input, shape index: {}]   ;;  %s184_s3 = inlined_call_operand.vmem [shape: f32[16,50], index: 3, kind: output, shape index: {}]  }
   0x1   :  { %120 = vmatprep.subr.bf16.mxu0 %v132_v0  ;;  %v130_v1 = vld [vmem:[%s181_s1] sm:$0xff]   ;;  %124 = vmatprep.mubr.msk.bf16.mxu0 %vm133_vm1, %v132_v0  ;;  %20 = vst.msk [vmem:[#allocation2] sm:$0xff] %vm19_vm0, %v132_v0  ;;  %21 = vst.msk [vmem:[#allocation2 + $0x8] sm:$0xff] %vm19_vm0, %v132_v0  ;;  %v131_v2 = vld [vmem:[%s181_s1 + $0x8] sm:$0xff]  }
   0x2   :  { %121 = vmatpush3.bf16.msra.mxu0 %v130_v1  ;;  %v28_v3 = vld [vmem:[%s182_s0] sm:$0xff]  ;;  %v29_v4 = vld [vmem:[%s182_s0 + $0x8] sm:$0xff] }
   0x3   :  { %122 = vmatprep.subr.bf16.mxu0 %v132_v0  ;;  %v30_v5 = vpack.c.bf16 %v29_v4, %v28_v3  ;;  %v116_v14 = vld [vmem:[%s183_s2] ss:$0 sm:$0xff] }
   0x6   :  { %123 = vmatpush3.bf16.msra.mxu0 %v131_v2 }
   0x8   :  { %v26_v6 = vld [vmem:[#allocation2] sm:$0xff]  ;;  %v27_v8 = vld [vmem:[#allocation2 + $0x8] sm:$0xff] }
   0x9   :  { %125 = vmatmul.mubr.msk.bf16.vlgmr.msra.gmra.mrb[0].mxu0 %vm43_vm2, %v30_v5 }
  0xdc   :  { %v81_v7 = vpop.f32.mrb[0].mxu0 }
  0xdd   :  { %v88_v9 = vadd.f32 %v81_v7, %v26_v6  ;;  %v126_v10 = vpop.f32.mrb[1].mxu0 }
  0xde   :  { %v84_v11 = vpop.f32.mrb[2].mxu0 }
  0xdf   :  { %91 = vst.msk [vmem:[#allocation2] sm:$0xff] %vm19_vm0, %v88_v9  ;;  %v89_v12 = vadd.f32 %v84_v11, %v27_v8  ;;  %v127_v13 = vpop.f32.mrb[3].mxu0 }
  0xe1   :  { %92 = vst.msk [vmem:[#allocation2 + $0x8] sm:$0xff] %vm19_vm0, %v89_v12 }
  0xe6   :  { %v96_v15 = vld [vmem:[#allocation2] sm:$0xff] }
  0xe7   :  { %v105_v16 = vadd.f32 %v116_v14, %v96_v15 }
  0xe8   :  { %v97_v17 = vld [vmem:[#allocation2 + $0x8] sm:$0xff] }
  0xe9   :  { %107 = vst.msk [vmem:[%s184_s3] sm:$0xff] %vm19_vm0, %v105_v16  ;;  %v106_v18 = vadd.f32 %v116_v14, %v97_v17 }
  0xeb   :  { %108 = vst.msk [vmem:[%s184_s3 + $0x8] sm:$0xff] %vm19_vm0, %v106_v18 }

// kernel: transformer_model_forward.3
= control target key start
LH: loop header
LB: loop body
LE: loop exit
PB: predicated region body
PF: predicated region fallthrough
CT: control target
= control target key end

     0   :  { %s1612_s25 = smov 0   ;;  %s1784_s0 = inlined_call_operand.vmem [shape: f32[2,8,32], index: 0, kind: input, shape index: {}]   ;;  %s1785_s1 = inlined_call_operand.vmem [shape: bf16[32,96], index: 1, kind: input, shape index: {}]   ;;  %s1786_s2 = inlined_call_operand.vmem [shape: f32[1,96], index: 2, kind: input, shape index: {}]   ;;  %s1787_s3 = inlined_call_operand.vmem [shape: bf16[32,32], index: 3, kind: input, shape index: {}]   ;;  %s1788_s4 = inlined_call_operand.vmem [shape: f32[1,32], index: 4, kind: input, shape index: {}]   ;;  %s1789_s5 = inlined_call_operand.vmem [shape: bf16[32,64], index: 5, kind: input, shape index: {}]   ;;  %s1790_s6 = inlined_call_operand.vmem [shape: f32[1,64], index: 6, kind: input, shape index: {}]   ;;  %s1791_s7 = inlined_call_operand.vmem [shape: bf16[64,32], index: 7, kind: input, shape index: {}]   ;;  %s1792_s8 = inlined_call_operand.vmem [shape: f32[1,32], index: 8, kind: input, shape index: {}]   ;;  %s1793_s9 = inlined_call_operand.vmem [shape: f32[1,32], index: 9, kind: input, shape index: {}]   ;;  %s1794_s10 = inlined_call_operand.vmem [shape: f32[1,32], index: 10, kind: input, shape index: {}]   ;;  %s1795_s11 = inlined_call_operand.vmem [shape: f32[1,32], index: 11, kind: input, shape index: {}]   ;;  %s1796_s12 = inlined_call_operand.vmem [shape: f32[1,32], index: 12, kind: input, shape index: {}]   ;;  %s1797_s13 = inlined_call_operand.vmem [shape: f32[2,8,32], index: 13, kind: output, shape index: {}]  }
   0x1 LB: > { %s1311_s26 = sadd.s32 4294967295, %s1524_s25   ;;  %p1315_p0 = scmp.ge.s32.totalorder %s1524_s25, 1  ;;  %s1524_s25 = sphi %s1612_s25, %s23_s25  }
   0x2   : > { %p386_p1 = scmp.lt.s32.totalorder %s1524_s25, 3 }
   0x4   : > { %p387_p2 = pnand %p1315_p0, %p386_p1 }
   0x5   : > { %v1488_v0 = vld [vmem:[%s1785_s1] sm:$0xff] (!%p387_p2)   ;;  %v1526_v1 = vmov (!%p387_p2), 0.0   ;;  %v1489_v2 = vld [vmem:[%s1785_s1 + $0x8] sm:$0xff] (!%p387_p2)   ;;  %vm1527_vm0 = vmmov (!%p387_p2), 0   ;;  %p428_p3 = scmp.lt.s32.totalorder (!%p387_p2), %s1311_s26, 1  ;;  %vm462_vm1 = vcmask (!%p387_p2), 261120   ;;  %v507_v25 = vlaneseq (!%p387_p2) }
   0x6   : > { %390 = sbr.rel (%p387_p2) target bundleno = 2558 (0x9fe), region = 72  ;;  %1380 = vmatprep.subr.bf16.mxu0 (!%p387_p2), %v1526_v1  ;;  %1388 = vmatprep.subr.bf16.mxu1 (!%p387_p2), %v1526_v1  ;;  %v1318_v5 = vld [vmem:[%s1786_s2] ss:$0 sm:$0xff] (!%p387_p2)  ;;  %s1528_s20 = smov (!%p387_p2), 96   ;;  %vm517_vm2 = vcmask (!%p387_p2), 64512   ;;  %vm582_vm4 = vcmask (!%p387_p2), 1043456  }
   0x7   : > { %1381 = vmatpush3.bf16.msra.mxu0 (!%p387_p2), %v1488_v0  ;;  %1384 = vmatprep.mubr.msk.bf16.mxu0 (!%p387_p2), %vm1527_vm0, %v1526_v1  ;;  %s1529_s21 = smov (!%p387_p2), 120   ;;  %s1530_s22 = smov (!%p387_p2), 88   ;;  %v508_v26 = vshrl.u32 (!%p387_p2), %v507_v25, 7  ;;  %v510_v27 = vand.u32 (!%p387_p2), 127, %v507_v25  ;;  %vm973_vm5 = vcmask (!%p387_p2), 130048   ;;  %vm975_vm6 = vcmask (!%p387_p2), 195584  }
   0x8   : > { %1382 = vmatprep.subr.bf16.mxu0 (!%p387_p2), %v1526_v1  ;;  %1390 = vmatprep.mubr.msk.bf16.mxu1 (!%p387_p2), %vm1527_vm0, %v1526_v1  ;;  %s1531_s23 = smov (!%p387_p2), 80   ;;  %s1532_s24 = smov (!%p387_p2), 112   ;;  %vm1183_vm7 = vcmask (!%p387_p2), 523264  }
   0x9   : > { %s1533_s27 = smov (!%p387_p2), 72   ;;  %s1534_s28 = smov (!%p387_p2), 104   ;;  %vm511_vm3 = vcmp.le.s32.totalorder (!%p387_p2), %v510_v27, %v508_v26 }
   0xa   : > { %s1535_s29 = smov (!%p387_p2), 56   ;;  %s1536_s30 = smov (!%p387_p2), 64  }
   0xb   : > { %1383 = vmatpush3.bf16.msra.mxu0 (!%p387_p2), %v1489_v2  ;;  %s1537_s15 = smov (!%p387_p2), 40   ;;  %s1538_s16 = smov (!%p387_p2), 48  }
   0xc   : > { %1394 = vmatprep.subr.bf16.mxu0 (!%p387_p2), %v1526_v1 }
   0xd   : > { %s1799_s26 = smov (!%p428_p3, %s1311_s26), 1 }
   0xe   : > { %s1316_s14 = sshll.u32 %s1799_s26, 3 }
   0xf   : > { %s431_s17 = scalar_lea.vmem %s1784_s0, %s1316_s14 }
  0x10   : > { %v1642_v3 = vld [vmem:[%s431_s17] sm:$0xff]  ;;  %s1539_s17 = smov 8  }
  0x11   : > { %v442_v4 = vpack.c.bf16 %v1642_v3, %v1642_v3 }
  0x13   : > { %1385 = vmatmul.mubr.msk.bf16.vlgmr.msra.gmra.mrb[0].mxu0 %vm462_vm1, %v442_v4 }
  0x14   : > { %1396 = vmatprep.mubr.msk.bf16.mxu0 %vm1527_vm0, %v1526_v1 }
  0xe6   : > { %v500_v6 = vpop.f32.mrb[0].mxu0 }
  0xe7   : > { %v501_v7 = vadd.f32 %v1318_v5, %v500_v6  ;;  %v1386_v8 = vpop.f32.mrb[1].mxu0 }
  0xe8   : > { %v503_v9 = vpop.f32.mrb[2].mxu0 }
  0xe9   : > { %v506_v10 = vmul.f32 0.35355338, %v501_v7  ;;  %v1652_v11 = vpack.c.bf16 %v501_v7, %v501_v7  ;;  %v1387_v12 = vpop.f32.mrb[3].mxu0 }
  0xeb   : > { %v512_v13 = vpack.c.bf16 %v506_v10, %v506_v10  ;;  %515 = vrot.lane.b32.xlu0 %v1652_v11, %s1528_s20 }
  0xed   : > { %627 = vrot.lane.b32.xlu1 %v512_v13, %s1529_s21 }
  0xef   : > { %629 = vrot.lane.b32.xlu0 %v1652_v11, %s1530_s22  ;;  %s1540_s22 = smov 16  }
  0xf1   : > { %740 = vrot.lane.b32.xlu1 %v1652_v11, %s1531_s23  ;;  %s1541_s23 = smov 24  }
  0xf3   : > { %738 = vrot.lane.b32.xlu0 %v512_v13, %s1532_s24  ;;  %s435_s24 = scalar_lea.vmem %s1797_s13, %s1316_s14 }
  0xf5   : > { %851 = vrot.lane.b32.xlu1 %v1652_v11, %s1533_s27 }
  0xf7   : > { %849 = vrot.lane.b32.xlu0 %v512_v13, %s1534_s28 }
 0x15d   : > { %v516_v14 = vpop.permute.xlu0 %515 }
 0x15e   : > { %v522_v15 = vsel %vm517_vm2, %v516_v14, 0 }
 0x15f   : > { %1389 = vmatpush3.bf16.xpose.msra.mxu1 %v522_v15  ;;  %v628_v17 = vpop.permute.xlu1 %627 }
 0x160   : > { %1400 = vmatprep.subr.bf16.mxu1 %v1526_v1 }
 0x161   : > { %v630_v16 = vpop.permute.xlu0 %629 }
 0x162   : > { %v635_v18 = vsel %vm517_vm2, %v630_v16, 0 }
 0x163   : > { %v741_v19 = vpop.permute.xlu1 %740 }
 0x164   : > { %v746_v20 = vsel %vm517_vm2, %v741_v19, 0 }
 0x165   : > { %v739_v22 = vpop.permute.xlu0 %738 }
 0x166   : > { %1391 = vmatmul.mubr.msk.bf16.vlgmr.msra.gmra.mrb[0].mxu1 %vm517_vm2, %v512_v13 }
 0x167   : > { %1401 = vmatpush3.bf16.xpose.msra.mxu1 %v635_v18  ;;  %1402 = vmatprep.mubr.msk.bf16.mxu1 %vm1527_vm0, %v1526_v1  ;;  %v852_v21 = vpop.permute.xlu1 %851 }
 0x168   : > { %1412 = vmatprep.subr.bf16.mxu1 %v1526_v1  ;;  %v857_v23 = vsel %vm517_vm2, %v852_v21, 0 }
 0x169   : > { %v850_v24 = vpop.permute.xlu0 %849 }
 0x16e   : > { %1403 = vmatmul.mubr.msk.bf16.vlgmr.msra.gmra.mrb[4].mxu1 %vm517_vm2, %v628_v17 }
 0x16f   : > { %1413 = vmatpush3.bf16.xpose.msra.mxu1 %v746_v20  ;;  %1414 = vmatprep.mubr.msk.bf16.mxu1 %vm1527_vm0, %v1526_v1 }
 0x170   : > { %1424 = vmatprep.subr.bf16.mxu1 %v1526_v1 }
 0x176   : > { %1415 = vmatmul.mubr.msk.bf16.vlgmr.msra.gmra.mrb[8].mxu1 %vm517_vm2, %v739_v22 }
 0x177   : > { %1425 = vmatpush3.bf16.xpose.msra.mxu1 %v857_v23  ;;  %1426 = vmatprep.mubr.msk.bf16.mxu1 %vm1527_vm0, %v1526_v1 }
 0x178   : > { %1436 = vmatprep.subr.bf16.mxu1 %v1526_v1 }
 0x17e   : > { %1427 = vmatmul.mubr.msk.bf16.vlgmr.msra.gmra.mrb[12].mxu1 %vm517_vm2, %v850_v24 }
 0x17f   : > { %1440 = vmatprep.mubr.msk.bf16.mxu1 %vm1527_vm0, %v1526_v1 }
 0x239   : > { %v558_v28 = vpop.f32.mrb[0].mxu1 }
 0x23a   : > { %v564_v29 = vsel %vm511_vm3, %v558_v28, -1e+30  ;;  %v1392_v30 = vpop.f32.mrb[1].mxu1 }
 0x23b   : > { %v561_v31 = vpop.f32.mrb[2].mxu1  ;;  %v565_v32 = vsel %vm517_vm2, %v564_v29, -inf }
 0x23c   : > { %566 = vmax.xlane.f32.xlu1 %v565_v32  ;;  %v1393_v33 = vpop.f32.mrb[3].mxu1 }
 0x241   : > { %v671_v34 = vpop.f32.mrb[4].mxu1 }
 0x242   : > { %v677_v35 = vsel %vm511_vm3, %v671_v34, -1e+30  ;;  %v1404_v36 = vpop.f32.mrb[5].mxu1 }
 0x243   : > { %v674_v37 = vpop.f32.mrb[6].mxu1  ;;  %v678_v38 = vsel %vm517_vm2, %v677_v35, -inf }
 0x244   : > { %679 = vmax.xlane.f32.xlu0 %v678_v38  ;;  %v1405_v39 = vpop.f32.mrb[7].mxu1 }
 0x249   : > { %v782_v40 = vpop.f32.mrb[8].mxu1 }
 0x24a   : > { %v788_v41 = vsel %vm511_vm3, %v782_v40, -1e+30  ;;  %v1416_v42 = vpop.f32.mrb[9].mxu1 }
 0x24b   : > { %v785_v43 = vpop.f32.mrb[10].mxu1  ;;  %v789_v44 = vsel %vm517_vm2, %v788_v41, -inf  ;;  %v1490_v42 = vld [vmem:[%s1787_s3] sm:$0xff]  }
 0x24c   : > { %790 = vmax.xlane.f32.xlu0 %v789_v44  ;;  %v1417_v45 = vpop.f32.mrb[11].mxu1  ;;  %1437 = vmatpush3.bf16.msra.mxu1 %v1490_v42  ;;  %v1491_v43 = vld [vmem:[%s1787_s3 + $0x8] sm:$0xff]  }
 0x24d   : > { %1438 = vmatprep.subr.bf16.mxu1 %v1526_v1 }
 0x250   : > { %1439 = vmatpush3.bf16.msra.mxu1 %v1491_v43 }
 0x251   : > { %v893_v46 = vpop.f32.mrb[12].mxu1  ;;  %1452 = vmatprep.subr.bf16.mxu1 %v1526_v1 }
 0x252   : > { %v899_v47 = vsel %vm511_vm3, %v893_v46, -1e+30  ;;  %v1428_v48 = vpop.f32.mrb[13].mxu1 }
 0x253   : > { %v896_v49 = vpop.f32.mrb[14].mxu1  ;;  %v900_v50 = vsel %vm517_vm2, %v899_v47, -inf }
 0x254   : > { %901 = vmax.xlane.f32.xlu1 %v900_v50  ;;  %v1429_v51 = vpop.f32.mrb[15].mxu1 }
 0x2c9   : > { %v567_v52 = vpop.xlane.xlu1 %566 }
 0x2ca   : > { %v568_v53 = vsub.f32 %v564_v29, %v567_v52 }
 0x2cc   : > { %v569_v54 = vmul.f32 1.442695, %v568_v53 }
 0x2ce   : > { %1498 = vpow2.f32 %v569_v54 }
 0x2d1   : > { %v680_v55 = vpop.xlane.xlu0 %679 }
 0x2d2   : > { %v681_v56 = vsub.f32 %v677_v35, %v680_v55 }
 0x2d4   : > { %v682_v57 = vmul.f32 1.442695, %v681_v56 }
 0x2d6   : > { %1500 = vpow2.f32 %v682_v57 }
 0x2d8   : > { %v1499_v58 = vpop.eup %1498 }
 0x2d9   : > { %v791_v59 = vpop.xlane.xlu0 %790  ;;  %v571_v60 = vsel %vm517_vm2, %v1499_v58, 0.0 }
 0x2da   : > { %v792_v61 = vsub.f32 %v788_v41, %v791_v59  ;;  %572 = vadd.xlane.f32.xlu0 %v571_v60  ;;  %v1330_v59 = vld [vmem:[%s1788_s4] ss:$0 sm:$0xff] }
 0x2dc   : > { %v793_v62 = vmul.f32 1.442695, %v792_v61 }
 0x2de   : > { %1502 = vpow2.f32 %v793_v62 }
 0x2e0   : > { %v1501_v63 = vpop.eup %1500 }
 0x2e1   : > { %v684_v0 = vsel %vm517_vm2, %v1501_v63, 0.0  ;;  %v902_v5 = vpop.xlane.xlu1 %901 }
 0x2e2   : > { %685 = vadd.xlane.f32.xlu1 %v684_v0  ;;  %v903_v6 = vsub.f32 %v899_v47, %v902_v5 }
 0x2e4   : > { %v904_v7 = vmul.f32 1.442695, %v903_v6 }
 0x2e6   : > { %1504 = vpow2.f32 %v904_v7 }
 0x2e8   : > { %v1503_v2 = vpop.eup %1502 }
 0x2e9   : > { %v795_v4 = vsel %vm517_vm2, %v1503_v2, 0.0 }
 0x2ea   : > { %796 = vadd.xlane.f32.xlu0 %v795_v4 }
 0x2f0   : > { %v1505_v8 = vpop.eup %1504 }
 0x2f1   : > { %v906_v9 = vsel %vm517_vm2, %v1505_v8, 0.0 }
 0x2f3   : > { %690 = vrot.lane.b32.xlu1 %v1652_v11, %s1535_s29 }
 0x300   : > { %577 = vrot.lane.b32.xlu0 %v1652_v11, %s1536_s30 }
 0x304   : > { %912 = vrot.lane.b32.xlu0 %v1652_v11, %s1537_s15 }
 0x317   : > { %907 = vadd.xlane.f32.xlu1 %v906_v9 }
 0x328   : > { %801 = vrot.lane.b32.xlu1 %v1652_v11, %s1538_s16 }
 0x367   : > { %v573_v10 = vpop.xlane.xlu0 %572 }
 0x368   : > { %1506 = vrcp.f32 %v573_v10  ;;  %v1492_v10 = vld [vmem:[%s1789_s5] sm:$0xff]  }
 0x36f   : > { %v686_v12 = vpop.xlane.xlu1 %685 }
 0x370   : > { %1508 = vrcp.f32 %v686_v12  ;;  %v1494_v12 = vld [vmem:[%s1791_s7] sm:$0xff]  }
 0x372   : > { %v1507_v13 = vpop.eup %1506 }
 0x373   : > { %v575_v15 = vmul.f32 %v1507_v13, %v1499_v58  ;;  %v691_v18 = vpop.permute.xlu1 %690  ;;  %v1495_v13 = vld [vmem:[%s1791_s7 + $0x8] sm:$0xff]  }
 0x374   : > { %v696_v21 = vsel %vm582_vm4, %v691_v18, 0  ;;  %v1334_v18 = vld [vmem:[%s1793_s9] ss:$0 sm:$0xff] }
 0x375   : > { %v576_v19 = vpack.c.bf16 %v575_v15, %v575_v15 }
 0x377   : > { %v797_v14 = vpop.xlane.xlu0 %796 }
 0x378   : > { %1510 = vrcp.f32 %v797_v14 }
 0x37a   : > { %v1509_v20 = vpop.eup %1508 }
 0x37b   : > { %v578_v16 = vpop.permute.xlu0 %577  ;;  %v688_v11 = vmul.f32 %v1509_v20, %v1501_v63  ;;  %v1335_v20 = vld [vmem:[%s1794_s10] ss:$0 sm:$0xff] }
 0x37c   : > { %v584_v17 = vsel %vm582_vm4, %v578_v16, 0 }
 0x37d   : > { %1395 = vmatpush3.bf16.msra.mxu0 %v584_v17  ;;  %v689_v22 = vpack.c.bf16 %v688_v11, %v688_v11 }
 0x37e   : > { %1406 = vmatprep.subr.bf16.mxu0 %v1526_v1 }
 0x37f   : > { %v913_v28 = vpop.permute.xlu0 %912 }
 0x380   : > { %1397 = vmatmul.mubr.msk.bf16.vlgmr.msra.gmra.mrb[4].mxu0 %vm517_vm2, %v576_v19  ;;  %v918_v30 = vsel %vm582_vm4, %v913_v28, 0 }
 0x381   : > { %1407 = vmatpush3.bf16.msra.mxu0 %v696_v21  ;;  %1408 = vmatprep.mubr.msk.bf16.mxu0 %vm1527_vm0, %v1526_v1 }
 0x382   : > { %1418 = vmatprep.subr.bf16.mxu0 %v1526_v1  ;;  %v1511_v23 = vpop.eup %1510 }
 0x383   : > { %v799_v25 = vmul.f32 %v1511_v23, %v1503_v2  ;;  %v1496_v23 = vld [vmem:[%s1791_s7 + $0x10] sm:$0xff]  }
 0x385   : > { %v800_v29 = vpack.c.bf16 %v799_v25, %v799_v25  ;;  %v1336_v25 = vld [vmem:[%s1790_s6] ss:$0 sm:$0xff] }
 0x388   : > { %1409 = vmatmul.mubr.msk.bf16.vlgmr.msra.gmra.mrb[8].mxu0 %vm517_vm2, %v689_v22 }
 0x389   : > { %1420 = vmatprep.mubr.msk.bf16.mxu0 %vm1527_vm0, %v1526_v1 }
 0x3a4   : > { %v908_v24 = vpop.xlane.xlu1 %907 }
 0x3a5   : > { %1512 = vrcp.f32 %v908_v24  ;;  %v1497_v24 = vld [vmem:[%s1791_s7 + $0x18] sm:$0xff]  }
 0x3a8   : > { %v802_v26 = vpop.permute.xlu1 %801 }
 0x3a9   : > { %v807_v27 = vsel %vm582_vm4, %v802_v26, 0 }
 0x3aa   : > { %1419 = vmatpush3.bf16.msra.mxu0 %v807_v27 }
 0x3ab   : > { %1430 = vmatprep.subr.bf16.mxu0 %v1526_v1 }
 0x3ad   : > { %1421 = vmatmul.mubr.msk.bf16.vlgmr.msra.gmra.mrb[12].mxu0 %vm517_vm2, %v800_v29 }
 0x3ae   : > { %1431 = vmatpush3.bf16.msra.mxu0 %v918_v30  ;;  %1432 = vmatprep.mubr.msk.bf16.mxu0 %vm1527_vm0, %v1526_v1 }
 0x3af   : > { %v1513_v31 = vpop.eup %1512  ;;  %1444 = vmatprep.subr.bf16.mxu0 %v1526_v1 }
 0x3b0   : > { %v910_v32 = vmul.f32 %v1513_v31, %v1505_v8 }
 0x3b2   : > { %v911_v33 = vpack.c.bf16 %v910_v32, %v910_v32 }
 0x3b5   : > { %1433 = vmatmul.mubr.msk.bf16.vlgmr.msra.gmra.mrb[16].mxu0 %vm517_vm2, %v911_v33 }
 0x3b6   : > { %1448 = vmatprep.mubr.msk.bf16.mxu0 %vm1527_vm0, %v1526_v1  ;;  %1445 = vmatpush3.bf16.msra.mxu0 %v1492_v10 }
 0x3b7   : > { %1446 = vmatprep.subr.bf16.mxu0 %v1526_v1 }
 0x453   : > { %v620_v34 = vpop.f32.mrb[4].mxu0 }
 0x454   : > { %v1398_v35 = vpop.f32.mrb[5].mxu0 }
 0x455   : > { %v623_v36 = vpop.f32.mrb[6].mxu0 }
 0x456   : > { %v1399_v37 = vpop.f32.mrb[7].mxu0 }
 0x45b   : > { %v732_v38 = vpop.f32.mrb[8].mxu0 }
 0x45c   : > { %961 = vrot.lane.b32.xlu1 %v732_v38, %s1539_s17  ;;  %v1410_v39 = vpop.f32.mrb[9].mxu0 }
 0x45d   : > { %v735_v40 = vpop.f32.mrb[10].mxu0 }
 0x45e   : > { %v1411_v41 = vpop.f32.mrb[11].mxu0 }
 0x480   : > { %v843_v44 = vpop.f32.mrb[12].mxu0 }
 0x481   : > { %965 = vrot.lane.b32.xlu0 %v843_v44, %s1540_s22  ;;  %v1422_v45 = vpop.f32.mrb[13].mxu0 }
 0x482   : > { %v846_v46 = vpop.f32.mrb[14].mxu0 }
 0x483   : > { %v1423_v47 = vpop.f32.mrb[15].mxu0 }
 0x488   : > { %v954_v48 = vpop.f32.mrb[16].mxu0 }
 0x489   : > { %969 = vrot.lane.b32.xlu1 %v954_v48, %s1541_s23  ;;  %v1434_v49 = vpop.f32.mrb[17].mxu0 }
 0x48a   : > { %v957_v50 = vpop.f32.mrb[18].mxu0  ;;  %v1346_v49 = vld [vmem:[%s1795_s11] ss:$0 sm:$0xff] }
 0x48b   : > { %v1435_v51 = vpop.f32.mrb[19].mxu0 }
 0x48c   : > { %v1347_v51 = vld [vmem:[%s1796_s12] ss:$0 sm:$0xff] }
 0x4ce   : > { %v962_v52 = vpop.permute.xlu1 %961 }
 0x4cf   : > { %v972_v54 = vsel %vm517_vm2, %v620_v34, %v962_v52 }
 0x4f3   : > { %v966_v53 = vpop.permute.xlu0 %965 }
 0x4f4   : > { %v974_v55 = vsel %vm973_vm5, %v972_v54, %v966_v53 }
 0x4fb   : > { %v970_v56 = vpop.permute.xlu1 %969 }
 0x4fc   : > { %v976_v57 = vsel %vm975_vm6, %v974_v55, %v970_v56 }
 0x4fd   : > { %v977_v58 = vpack.c.bf16 %v976_v57, %v976_v57 }
 0x4ff   : > { %1441 = vmatmul.mubr.msk.bf16.vlgmr.msra.gmra.mrb[16].mxu1 %vm462_vm1, %v977_v58 }
 0x500   : > { %1460 = vmatprep.mubr.msk.bf16.mxu1 %vm1527_vm0, %v1526_v1  ;;  %1453 = vmatpush3.bf16.msra.mxu1 %v1494_v12 }
 0x501   : > { %1454 = vmatprep.subr.bf16.mxu1 %v1526_v1 }
 0x504   : > { %1455 = vmatpush3.bf16.msra.mxu1 %v1495_v13 }
 0x505   : > { %1456 = vmatprep.subr.bf16.mxu1 %v1526_v1 }
 0x508   : > { %1457 = vmatpush3.bf16.msra.mxu1 %v1496_v23 }
 0x509   : > { %1458 = vmatprep.subr.bf16.mxu1 %v1526_v1  ;;  %v1340_v1 = vld [vmem:[%s1792_s8] ss:$0 sm:$0xff] }
 0x50c   : > { %1459 = vmatpush3.bf16.msra.mxu1 %v1497_v24 }
 0x5d2   : > { %v1038_v60 = vpop.f32.mrb[16].mxu1 }
 0x5d3   : > { %v1039_v61 = vadd.f32 %v1330_v59, %v1038_v60  ;;  %v1442_v62 = vpop.f32.mrb[17].mxu1 }
 0x5d4   : > { %v1041_v63 = vpop.f32.mrb[18].mxu1 }
 0x5d5   : > { %v1443_v0 = vpop.f32.mrb[19].mxu1  ;;  %v1044_v2 = vadd.f32 %v1039_v61, %v1642_v3  ;;  %v1493_v3 = vld [vmem:[%s1789_s5 + $0x8] sm:$0xff]  }
 0x5d6   : > { %1447 = vmatpush3.bf16.msra.mxu0 %v1493_v3 }
 0x5d7   : > { %v1045_v4 = vsel %vm462_vm1, %v1044_v2, 0.0 }
 0x5d8   : > { %1046 = vadd.xlane.f32.xlu0 %v1045_v4 }
 0x665   : > { %v1047_v5 = vpop.xlane.xlu0 %1046 }
 0x666   : > { %v1049_v6 = vmul.f32 0.03125, %v1047_v5 }
 0x668   : > { %v1050_v7 = vsub.f32 %v1044_v2, %v1049_v6 }
 0x66a   : > { %v1051_v8 = vmul.f32 %v1050_v7, %v1050_v7 }
 0x66c   : > { %v1052_v9 = vsel %vm462_vm1, %v1051_v8, 0.0 }
 0x66d   : > { %1053 = vadd.xlane.f32.xlu1 %v1052_v9 }
 0x6fa   : > { %v1054_v14 = vpop.xlane.xlu1 %1053 }
 0x6fb   : > { %v1055_v15 = vmul.f32 0.03125, %v1054_v14 }
 0x6fd   : > { %v1056_v16 = vadd.f32 1e-05, %v1055_v15 }
 0x6ff   : > { %1514 = vrsqrt.f32 %v1056_v16 }
 0x709   : > { %v1515_v17 = vpop.eup %1514 }
 0x70a   : > { %v1058_v19 = vmul.f32 %v1515_v17, %v1050_v7 }
 0x70c   : > { %v1066_v21 = vmul.f32 %v1334_v18, %v1058_v19 }
 0x70e   : > { %v1074_v11 = vadd.f32 %v1335_v20, %v1066_v21 }
 0x710   : > { %v1075_v22 = vpack.c.bf16 %v1074_v11, %v1074_v11 }
 0x712   : > { %1449 = vmatmul.mubr.msk.bf16.vlgmr.msra.gmra.mrb[20].mxu0 %vm462_vm1, %v1075_v22 }
 0x7e5   : > { %v1136_v26 = vpop.f32.mrb[20].mxu0 }
 0x7e6   : > { %v1137_v27 = vadd.f32 %v1336_v25, %v1136_v26  ;;  %v1450_v28 = vpop.f32.mrb[21].mxu0 }
 0x7e7   : > { %v1139_v29 = vpop.f32.mrb[22].mxu0 }
 0x7e8   : > { %v1142_v30 = vmax.f32 %v1137_v27, 0.0  ;;  %v1451_v31 = vpop.f32.mrb[23].mxu0 }
 0x7ea   : > { %v1143_v32 = vpack.c.bf16 %v1142_v30, %v1142_v30 }
 0x7ec   : > { %1461 = vmatmul.mubr.msk.bf16.vlgmr.msra.gmra.mrb[20].mxu1 %vm1183_vm7, %v1143_v32 }
 0x8bf   : > { %v1221_v33 = vpop.f32.mrb[20].mxu1 }
 0x8c0   : > { %v1222_v34 = vadd.f32 %v1340_v1, %v1221_v33  ;;  %v1462_v35 = vpop.f32.mrb[21].mxu1 }
 0x8c1   : > { %v1224_v36 = vpop.f32.mrb[22].mxu1 }
 0x8c2   : > { %v1463_v37 = vpop.f32.mrb[23].mxu1  ;;  %v1227_v38 = vadd.f32 %v1222_v34, %v1074_v11 }
 0x8c4   : > { %v1228_v39 = vsel %vm462_vm1, %v1227_v38, 0.0 }
 0x8c5   : > { %1229 = vadd.xlane.f32.xlu0 %v1228_v39 }
 0x952   : > { %v1230_v40 = vpop.xlane.xlu0 %1229 }
 0x953   : > { %v1231_v41 = vmul.f32 0.03125, %v1230_v40 }
 0x955   : > { %v1232_v42 = vsub.f32 %v1227_v38, %v1231_v41 }
 0x957   : > { %v1233_v43 = vmul.f32 %v1232_v42, %v1232_v42 }
 0x959   : > { %v1234_v44 = vsel %vm462_vm1, %v1233_v43, 0.0 }
 0x95a   : > { %1235 = vadd.xlane.f32.xlu0 %v1234_v44 }
 0x9e7   : > { %v1236_v45 = vpop.xlane.xlu0 %1235 }
 0x9e8   : > { %v1237_v46 = vmul.f32 0.03125, %v1236_v45 }
 0x9ea   : > { %v1238_v47 = vadd.f32 1e-05, %v1237_v46 }
 0x9ec   : > { %1516 = vrsqrt.f32 %v1238_v47 }
 0x9f6   : > { %v1517_v48 = vpop.eup %1516 }
 0x9f7   : > { %v1240_v50 = vmul.f32 %v1517_v48, %v1232_v42 }
 0x9f9   : > { %v1248_v52 = vmul.f32 %v1346_v49, %v1240_v50 }
 0x9fb   : > { %v1256_v53 = vadd.f32 %v1347_v51, %v1248_v52 }
 0x9fd   : > { %1257 = vst.msk [vmem:[%s435_s24] sm:$0xff] %vm462_vm1, %v1256_v53 }
 0x9fe PF: > { %s23_s25 = sadd.s32 1, %s1524_s25  }
 0x9ff   : > { %p20_p4 = scmp.ge.s32.totalorder %s23_s25, 4  }
 0xa01   :  { %22 = sbr.rel (!%p20_p4) target bundleno = 1 (0x1), region = 102 }

</bundles_post_ra>
